<compile_context>
chip_gen: v5e
topology: v5e:2x2
jax: 0.10.0
libtpu: 0.0.40
codegen_flags: <defaults>
</compile_context>

<pallas_src>
import functools

import jax
import jax.numpy as jnp
from jax.experimental import pallas as pl
from jax.experimental.pallas import tpu as pltpu

LN_EPS = 1e-5  # nn.LayerNorm default eps


def adapter_kernel(n_adapter, bt, d_out, matmul_dtype,
                   x_ref, wproj_ref, bproj_ref, cwst_ref, cb_ref,
                   gamma_ref, beta_ref, out_ref, stack_ref):
    L = out_ref.shape[1]
    D = d_out
    N = bt * D
    D_in = x_ref.shape[2]
    sdt = matmul_dtype

    # ---- dim_projection: ONE fused (bt*L, D_in) @ (D_in, D_out) MXU matmul.
    x2 = x_ref[...].reshape(bt * L, D_in).astype(sdt)
    y2 = jnp.dot(x2, wproj_ref[...], preferred_element_type=jnp.float32)
    y2 = y2 + bproj_ref[...]

    # Relayout (bt*L, D) -> lane-batched (L, bt*D) slab by storing each
    # example's rows straight into the centre band of the conv-tap scratch
    # (rows [L, 2L)); this is also the first conv layer's centre tap.
    for b in range(bt):
        stack_ref[L:2 * L, b * D:(b + 1) * D] = (
            y2[b * L:(b + 1) * L, :].astype(sdt))
    z = stack_ref[L:2 * L, :].astype(jnp.float32)   # residual stream (f32)

    # ---- Hoisted edge masks for the +-1 shifts of the k=3 / pad=1 conv.
    # Lane column c = b*D + d; shifts must not leak across example
    # boundaries, so zero d==0 on the prev tap and d==D-1 on the next tap.
    col = jax.lax.broadcasted_iota(jnp.int32, (1, N), 1)
    d_idx = col % D
    prev_mask = (d_idx != 0).astype(jnp.float32)
    next_mask = (d_idx != D - 1).astype(jnp.float32)

    def set_center(v):
        stack_ref[L:2 * L, :] = v.astype(sdt)

    def conv_k3(center_f32, l):
        # Pre-condition: stack rows [L, 2L) already hold `center_f32`.
        # Only the two rolled/masked halo bands are written per layer; the
        # whole (3L, N) stack then feeds ONE (L,3L)@(3L,N) MXU matmul:
        #   [w_prev | w_center | w_next] @ [z_prev ; z ; z_next]
        zp = pltpu.roll(center_f32, shift=1, axis=1) * prev_mask      # x[:, d-1]
        zn = pltpu.roll(center_f32, shift=N - 1, axis=1) * next_mask  # x[:, d+1]
        stack_ref[0:L, :] = zp.astype(sdt)
        stack_ref[2 * L:3 * L, :] = zn.astype(sdt)
        out = jnp.dot(cwst_ref[l], stack_ref[...],
                      preferred_element_type=jnp.float32)
        return out + cb_ref[l]

    # back_bone1 (conv layers 0 .. 2*n_adapter-1)
    # TODO(synk): switch to lax.fori_loop with dynamic cwst_ref[l] indexing if
    # bundle dumps show vreg/VMEM spills at large batch tiles / n_adapter.
    for i in range(n_adapter):
        r = jnp.maximum(conv_k3(z, 2 * i), 0.0)     # ReLU
        set_center(r)                               # r = next conv's centre
        z = z + conv_k3(r, 2 * i + 1)               # residual add
        if i == n_adapter - 1:
            z = jnp.maximum(z, 0.0)                 # ReLU between backbones
        set_center(z)

    # back_bone2 (conv layers 2*n_adapter .. 4*n_adapter-1)
    off = 2 * n_adapter
    for i in range(n_adapter):
        r = jnp.maximum(conv_k3(z, off + 2 * i), 0.0)
        set_center(r)
        z = z + conv_k3(r, off + 2 * i + 1)
        if i < n_adapter - 1:
            set_center(z)

    # ---- LayerNorm over each example's feature dim (single pass), then
    # lane-dense 128-wide stores per example.
    gamma = jnp.broadcast_to(gamma_ref[...], (L, D))   # hoisted broadcasts
    beta = jnp.broadcast_to(beta_ref[...], (L, D))
    for b in range(bt):
        tb = z[:, b * D:(b + 1) * D]                   # (L, D) slice
        mean = jnp.mean(tb, axis=-1, keepdims=True)
        var = jnp.mean(tb * tb, axis=-1, keepdims=True) - mean * mean
        norm = (tb - mean) * jax.lax.rsqrt(var + LN_EPS)
        out_ref[b] = (norm * gamma + beta).astype(out_ref.dtype)


def muti_task_adapter(x, params, n_adapter, *, batch_tile=None,
                      matmul_dtype=jnp.float32):
    """x: (B, L, D_in) with L = Conv1d channel axis (input_lens)."""
    Wp, bp, cw, cb, gamma, beta = params
    B, L, D_in = x.shape
    D_out = Wp.shape[1]
    n_conv = cw.shape[0]

    if batch_tile is None:
        # Several grid steps so the input/output DMA is pipelined against
        # compute and v7x's two TensorCores both get steps.
        bt = B
        for g in (8, 4, 2, 1):
            if B % g == 0:
                bt = B // g
                break
    else:
        bt = batch_tile
    assert B % bt == 0, "batch_tile must divide the batch"

    # Pre-stack the three conv taps into one (L, 3L) matrix per layer
    # (wrapper-side, free): W_l = [w_prev | w_center | w_next].
    cw_st = jnp.concatenate([cw[:, 0], cw[:, 1], cw[:, 2]], axis=2)
    # Cast matmul operands wrapper-side (halves weight VMEM when bf16).
    cw_st = cw_st.astype(matmul_dtype)
    Wp_mm = Wp.astype(matmul_dtype)

    # Explicit scoped-VMEM budget; cap below v7x's 64 MiB physical VMEM.
    f32 = 4
    need = (2 * bt * L * (D_in + D_out) * f32                       # in/out blocks (dbl buf)
            + 2 * (D_in * D_out + n_conv * L * (3 * L + 1) + 3 * D_out) * f32
            + (3 + 6) * L * bt * D_out * f32)                       # tap stack + live slabs
    vmem_limit = int(min(max(2 * need, 32 << 20), 60 << 20))

    kernel = functools.partial(adapter_kernel, n_adapter, bt, D_out,
                               matmul_dtype)
    # TODO(synk): tag the grid-invariant weight specs with
    # pipeline_mode=pl.Buffered(1) once single-buffering of constant operands
    # is needed at 768-dim sizes (halves their VMEM footprint).
    return pl.pallas_call(
        kernel,
        out_shape=jax.ShapeDtypeStruct((B, L, D_out), x.dtype),
        grid_spec=pltpu.PrefetchScalarGridSpec(
            num_scalar_prefetch=0,
            grid=(B // bt,),
            in_specs=[
                pl.BlockSpec((bt, L, D_in), lambda g: (g, 0, 0)),
                pl.BlockSpec((D_in, D_out), lambda g: (0, 0)),
                pl.BlockSpec((1, D_out), lambda g: (0, 0)),
                pl.BlockSpec((n_conv, L, 3 * L), lambda g: (0, 0, 0)),
                pl.BlockSpec((n_conv, L, 1), lambda g: (0, 0, 0)),
                pl.BlockSpec((1, D_out), lambda g: (0, 0)),
                pl.BlockSpec((1, D_out), lambda g: (0, 0)),
            ],
            out_specs=pl.BlockSpec((bt, L, D_out), lambda g: (g, 0, 0)),
            scratch_shapes=[pltpu.VMEM((3 * L, bt * D_out), matmul_dtype)],
        ),
        compiler_params=pltpu.CompilerParams(
            dimension_semantics=("parallel",),
            vmem_limit_bytes=vmem_limit),
    )(x, Wp_mm, bp, cw_st, cb, gamma, beta)


def reference_forward(x, params, n_adapter):
    """Pure-JAX reference mirroring the PyTorch forward."""
    Wp, bp, cw, cb, gamma, beta = params

    def conv(y, w, b):
        Lc, _ = y.shape
        zero = jnp.zeros((Lc, 1), y.dtype)
        y_prev = jnp.concatenate([zero, y[:, :-1]], axis=1)
        y_next = jnp.concatenate([y[:, 1:], zero], axis=1)
        return w[0] @ y_prev + w[1] @ y + w[2] @ y_next + b

    def per_example(xe):
        y = xe @ Wp + bp[0]

        def res(z, l0, l1):
            r = jnp.maximum(conv(z, cw[l0], cb[l0]), 0.0)
            r = conv(r, cw[l1], cb[l1])
            return z + r

        h = y
        for i in range(n_adapter):
            h = res(h, 2 * i, 2 * i + 1)
        t = jnp.maximum(h, 0.0)
        off = 2 * n_adapter
        for i in range(n_adapter):
            t = res(t, off + 2 * i, off + 2 * i + 1)
        mean = t.mean(-1, keepdims=True)
        var = ((t - mean) ** 2).mean(-1, keepdims=True)
        return (t - mean) / jnp.sqrt(var + LN_EPS) * gamma[0] + beta[0]

    return jax.vmap(per_example)(x)


if __name__ == "__main__":
    # Small shapes consistent with the module:
    #   input_lens=16 (Conv1d channels), input_dims=64, output_dims=128,
    #   n_adapter=2  (module defaults are 16 / 768 / 768 / 3).
    B, L, D_in, D_out, n_adapter = 2, 16, 64, 128, 2
    n_conv = 4 * n_adapter  # 2 convs per res block, 2 backbones

    key = jax.random.PRNGKey(0)
    k_x, k_wp, k_bp, k_cw, k_cb, k_g, k_b = jax.random.split(key, 7)

    x = jax.random.normal(k_x, (B, L, D_in), dtype=jnp.float32)

    # Deterministic synthetic parameters (shapes follow the module __init__).
    Wp = 0.05 * jax.random.normal(k_wp, (D_in, D_out), dtype=jnp.float32)
    bp = 0.02 * jax.random.normal(k_bp, (1, D_out), dtype=jnp.float32)
    # cw[l, k] corresponds to torch Conv1d weight[l][:, :, k] (out_ch, in_ch).
    cw = 0.06 * jax.random.normal(k_cw, (n_conv, 3, L, L), dtype=jnp.float32)
    cb = 0.02 * jax.random.normal(k_cb, (n_conv, L, 1), dtype=jnp.float32)
    gamma = 1.0 + 0.1 * jax.random.normal(k_g, (1, D_out), dtype=jnp.float32)
    beta = 0.05 * jax.random.normal(k_b, (1, D_out), dtype=jnp.float32)

    params = (Wp, bp, cw, cb, gamma, beta)

    out = muti_task_adapter(x, params, n_adapter)
    out = jax.block_until_ready(out)

    ref = jax.block_until_ready(reference_forward(x, params, n_adapter))
    assert out.shape == (B, L, D_out)
    max_err = float(jnp.max(jnp.abs(out - ref)))
    assert jnp.allclose(out, ref, atol=1e-4, rtol=1e-4), max_err

    print("KERNEL_OK")
</pallas_src>

<mosaic_0001>
module attributes {stable_mosaic.version = 11 : i64} {
  func.func @adapter_kernel(%arg0: i32, %arg1: memref<1x16x64xf32, #tpu.memory_space<vmem>>, %arg2: memref<64x128xf32, #tpu.memory_space<vmem>>, %arg3: memref<1x128xf32, #tpu.memory_space<vmem>>, %arg4: memref<8x16x48xf32, #tpu.memory_space<vmem>>, %arg5: memref<8x16x1xf32, #tpu.memory_space<vmem>>, %arg6: memref<1x128xf32, #tpu.memory_space<vmem>>, %arg7: memref<1x128xf32, #tpu.memory_space<vmem>>, %arg8: memref<1x16x128xf32, #tpu.memory_space<vmem>>, %arg9: memref<48x128xf32, #tpu.memory_space<vmem>>) attributes {dimension_semantics = [#tpu.dimension_semantics<parallel>], iteration_bounds = array<i64: 2>, scalar_prefetch = 0 : i64, scratch_operands = 1 : i64, tpu.core_type = #tpu.core_type<tc>, window_params = [{transform_indices = @transform_0, window_bounds = array<i64: 1, 16, 64>}, {pipeline_mode = #tpu.pipeline_mode<synchronous>, transform_indices = @transform_1, window_bounds = array<i64: 64, 128>}, {pipeline_mode = #tpu.pipeline_mode<synchronous>, transform_indices = @transform_2, window_bounds = array<i64: 1, 128>}, {pipeline_mode = #tpu.pipeline_mode<synchronous>, transform_indices = @transform_3, window_bounds = array<i64: 8, 16, 48>}, {pipeline_mode = #tpu.pipeline_mode<synchronous>, transform_indices = @transform_4, window_bounds = array<i64: 8, 16, 1>}, {pipeline_mode = #tpu.pipeline_mode<synchronous>, transform_indices = @transform_5, window_bounds = array<i64: 1, 128>}, {pipeline_mode = #tpu.pipeline_mode<synchronous>, transform_indices = @transform_6, window_bounds = array<i64: 1, 128>}, {transform_indices = @transform_7, window_bounds = array<i64: 1, 16, 128>}]} {
    %c0 = arith.constant 0 : index
    %c0_0 = arith.constant 0 : index
    %c0_1 = arith.constant 0 : index
    %0 = vector.load %arg1[%c0, %c0_0, %c0_1] : memref<1x16x64xf32, #tpu.memory_space<vmem>>, vector<1x16x64xf32>
    %1 = vector.shape_cast %0 : vector<1x16x64xf32> to vector<16x64xf32>
    %c0_2 = arith.constant 0 : index
    %c0_3 = arith.constant 0 : index
    %2 = vector.load %arg2[%c0_2, %c0_3] : memref<64x128xf32, #tpu.memory_space<vmem>>, vector<64x128xf32>
    %cst = arith.constant dense<0.000000e+00> : vector<16x128xf32>
    %3 = tpu.matmul %1, %2, %cst {dimension_numbers = #tpu.dot_dimension_numbers<[1], [0], [0], [1], [0, 0, 1, 1], [], []>} : vector<16x64xf32>, vector<64x128xf32>, vector<16x128xf32> -> vector<16x128xf32>
    %c0_4 = arith.constant 0 : index
    %c0_5 = arith.constant 0 : index
    %4 = vector.load %arg3[%c0_4, %c0_5] : memref<1x128xf32, #tpu.memory_space<vmem>>, vector<1x128xf32>
    %5 = vector.broadcast %4 : vector<1x128xf32> to vector<16x128xf32>
    %6 = arith.addf %3, %5 : vector<16x128xf32>
    %c16 = arith.constant 16 : index
    %c0_6 = arith.constant 0 : index
    %7 = vector.load %arg9[%c16, %c0_6] : memref<48x128xf32, #tpu.memory_space<vmem>>, vector<16x128xf32>
    tpu.vector_store %arg9[%c16, %c0_6], %6 {strides = array<i32>} : memref<48x128xf32, #tpu.memory_space<vmem>>, vector<16x128xf32>,
    %c16_7 = arith.constant 16 : index
    %c0_8 = arith.constant 0 : index
    %8 = vector.load %arg9[%c16_7, %c0_8] : memref<48x128xf32, #tpu.memory_space<vmem>>, vector<16x128xf32>
    %9 = tpu.iota {dimensions = array<i32: 1>} : vector<1x128xi32>
    %c128_i32 = arith.constant 128 : i32
    %c0_i32 = arith.constant 0 : i32
    %10 = arith.cmpi eq, %c128_i32, %c0_i32 : i32
    %c1_i32 = arith.constant 1 : i32
    %11 = arith.select %10, %c1_i32, %c128_i32 : i32
    %12 = vector.broadcast %11 : i32 to vector<1x128xi32>
    %13 = arith.remsi %9, %12 : vector<1x128xi32>
    %c0_i32_9 = arith.constant 0 : i32
    %14 = vector.broadcast %c0_i32_9 : i32 to vector<1x128xi32>
    %15 = arith.cmpi ne, %13, %14 : vector<1x128xi32>
    %c0_i32_10 = arith.constant 0 : i32
    %16 = vector.broadcast %c0_i32_10 : i32 to vector<1x128xi32>
    %17 = arith.cmpi slt, %13, %16 : vector<1x128xi32>
    %c0_i32_11 = arith.constant 0 : i32
    %18 = arith.cmpi slt, %11, %c0_i32_11 : i32
    %19 = vector.broadcast %18 : i1 to vector<1x128xi1>
    %20 = vector.broadcast %19 : vector<1x128xi1> to vector<1x128xi1>
    %21 = arith.xori %17, %20 : vector<1x128xi1>
    %22 = arith.andi %21, %15 : vector<1x128xi1>
    %23 = vector.broadcast %11 : i32 to vector<1x128xi32>
    %24 = arith.addi %13, %23 : vector<1x128xi32>
    %25 = arith.select %22, %24, %13 : vector<1x128xi1>, vector<1x128xi32>
    %c0_i32_12 = arith.constant 0 : i32
    %26 = vector.broadcast %c0_i32_12 : i32 to vector<1x128xi32>
    %27 = arith.cmpi ne, %25, %26 : vector<1x128xi32>
    %28 = arith.extui %27 : vector<1x128xi1> to vector<1x128xi32>
    %29 = arith.sitofp %28 : vector<1x128xi32> to vector<1x128xf32>
    %c127_i32 = arith.constant 127 : i32
    %30 = vector.broadcast %c127_i32 : i32 to vector<1x128xi32>
    %31 = arith.cmpi ne, %25, %30 : vector<1x128xi32>
    %32 = arith.extui %31 : vector<1x128xi1> to vector<1x128xi32>
    %33 = arith.sitofp %32 : vector<1x128xi32> to vector<1x128xf32>
    %c1_i32_13 = arith.constant 1 : i32
    %34 = tpu.dynamic_rotate %8 by %c1_i32_13 dim 1 : vector<16x128xf32>, i32 -> vector<16x128xf32>
    %35 = vector.broadcast %29 : vector<1x128xf32> to vector<16x128xf32>
    %36 = arith.mulf %34, %35 : vector<16x128xf32>
    %c127_i32_14 = arith.constant 127 : i32
    %37 = tpu.dynamic_rotate %8 by %c127_i32_14 dim 1 : vector<16x128xf32>, i32 -> vector<16x128xf32>
    %38 = vector.broadcast %33 : vector<1x128xf32> to vector<16x128xf32>
    %39 = arith.mulf %37, %38 : vector<16x128xf32>
    %c0_15 = arith.constant 0 : index
    %c0_16 = arith.constant 0 : index
    %40 = vector.load %arg9[%c0_15, %c0_16] : memref<48x128xf32, #tpu.memory_space<vmem>>, vector<16x128xf32>
    tpu.vector_store %arg9[%c0_15, %c0_16], %36 {strides = array<i32>} : memref<48x128xf32, #tpu.memory_space<vmem>>, vector<16x128xf32>,
    %c32 = arith.constant 32 : index
    %c0_17 = arith.constant 0 : index
    %41 = vector.load %arg9[%c32, %c0_17] : memref<48x128xf32, #tpu.memory_space<vmem>>, vector<16x128xf32>
    tpu.vector_store %arg9[%c32, %c0_17], %39 {strides = array<i32>} : memref<48x128xf32, #tpu.memory_space<vmem>>, vector<16x128xf32>,
    %c0_18 = arith.constant 0 : index
    %c0_19 = arith.constant 0 : index
    %c0_20 = arith.constant 0 : index
    %42 = vector.load %arg4[%c0_18, %c0_19, %c0_20] : memref<8x16x48xf32, #tpu.memory_space<vmem>>, vector<1x16x48xf32>
    %43 = vector.shape_cast %42 : vector<1x16x48xf32> to vector<16x48xf32>
    %c0_21 = arith.constant 0 : index
    %c0_22 = arith.constant 0 : index
    %44 = vector.load %arg9[%c0_21, %c0_22] : memref<48x128xf32, #tpu.memory_space<vmem>>, vector<48x128xf32>
    %cst_23 = arith.constant dense<0.000000e+00> : vector<16x128xf32>
    %45 = tpu.matmul %43, %44, %cst_23 {dimension_numbers = #tpu.dot_dimension_numbers<[1], [0], [0], [1], [0, 0, 1, 1], [], []>} : vector<16x48xf32>, vector<48x128xf32>, vector<16x128xf32> -> vector<16x128xf32>
    %c0_24 = arith.constant 0 : index
    %c0_25 = arith.constant 0 : index
    %c0_26 = arith.constant 0 : index
    %46 = vector.load %arg5[%c0_24, %c0_25, %c0_26] : memref<8x16x1xf32, #tpu.memory_space<vmem>>, vector<1x16x1xf32>
    %47 = vector.shape_cast %46 : vector<1x16x1xf32> to vector<16x1xf32>
    %48 = vector.broadcast %47 : vector<16x1xf32> to vector<16x128xf32>
    %49 = arith.addf %45, %48 : vector<16x128xf32>
    %cst_27 = arith.constant 0.000000e+00 : f32
    %50 = vector.broadcast %cst_27 : f32 to vector<16x128xf32>
    %51 = arith.maximumf %49, %50 : vector<16x128xf32>
    %c16_28 = arith.constant 16 : index
    %c0_29 = arith.constant 0 : index
    %52 = vector.load %arg9[%c16_28, %c0_29] : memref<48x128xf32, #tpu.memory_space<vmem>>, vector<16x128xf32>
    tpu.vector_store %arg9[%c16_28, %c0_29], %51 {strides = array<i32>} : memref<48x128xf32, #tpu.memory_space<vmem>>, vector<16x128xf32>,
    %c1_i32_30 = arith.constant 1 : i32
    %53 = tpu.dynamic_rotate %51 by %c1_i32_30 dim 1 : vector<16x128xf32>, i32 -> vector<16x128xf32>
    %54 = vector.broadcast %29 : vector<1x128xf32> to vector<16x128xf32>
    %55 = arith.mulf %53, %54 : vector<16x128xf32>
    %c127_i32_31 = arith.constant 127 : i32
    %56 = tpu.dynamic_rotate %51 by %c127_i32_31 dim 1 : vector<16x128xf32>, i32 -> vector<16x128xf32>
    %57 = vector.broadcast %33 : vector<1x128xf32> to vector<16x128xf32>
    %58 = arith.mulf %56, %57 : vector<16x128xf32>
    %c0_32 = arith.constant 0 : index
    %c0_33 = arith.constant 0 : index
    %59 = vector.load %arg9[%c0_32, %c0_33] : memref<48x128xf32, #tpu.memory_space<vmem>>, vector<16x128xf32>
    tpu.vector_store %arg9[%c0_32, %c0_33], %55 {strides = array<i32>} : memref<48x128xf32, #tpu.memory_space<vmem>>, vector<16x128xf32>,
    %c32_34 = arith.constant 32 : index
    %c0_35 = arith.constant 0 : index
    %60 = vector.load %arg9[%c32_34, %c0_35] : memref<48x128xf32, #tpu.memory_space<vmem>>, vector<16x128xf32>
    tpu.vector_store %arg9[%c32_34, %c0_35], %58 {strides = array<i32>} : memref<48x128xf32, #tpu.memory_space<vmem>>, vector<16x128xf32>,
    %c1 = arith.constant 1 : index
    %c0_36 = arith.constant 0 : index
    %c0_37 = arith.constant 0 : index
    %61 = vector.load %arg4[%c1, %c0_36, %c0_37] : memref<8x16x48xf32, #tpu.memory_space<vmem>>, vector<1x16x48xf32>
    %62 = vector.shape_cast %61 : vector<1x16x48xf32> to vector<16x48xf32>
    %c0_38 = arith.constant 0 : index
    %c0_39 = arith.constant 0 : index
    %63 = vector.load %arg9[%c0_38, %c0_39] : memref<48x128xf32, #tpu.memory_space<vmem>>, vector<48x128xf32>
    %cst_40 = arith.constant dense<0.000000e+00> : vector<16x128xf32>
    %64 = tpu.matmul %62, %63, %cst_40 {dimension_numbers = #tpu.dot_dimension_numbers<[1], [0], [0], [1], [0, 0, 1, 1], [], []>} : vector<16x48xf32>, vector<48x128xf32>, vector<16x128xf32> -> vector<16x128xf32>
    %c1_41 = arith.constant 1 : index
    %c0_42 = arith.constant 0 : index
    %c0_43 = arith.constant 0 : index
    %65 = vector.load %arg5[%c1_41, %c0_42, %c0_43] : memref<8x16x1xf32, #tpu.memory_space<vmem>>, vector<1x16x1xf32>
    %66 = vector.shape_cast %65 : vector<1x16x1xf32> to vector<16x1xf32>
    %67 = vector.broadcast %66 : vector<16x1xf32> to vector<16x128xf32>
    %68 = arith.addf %64, %67 : vector<16x128xf32>
    %69 = arith.addf %8, %68 : vector<16x128xf32>
    %c16_44 = arith.constant 16 : index
    %c0_45 = arith.constant 0 : index
    %70 = vector.load %arg9[%c16_44, %c0_45] : memref<48x128xf32, #tpu.memory_space<vmem>>, vector<16x128xf32>
    tpu.vector_store %arg9[%c16_44, %c0_45], %69 {strides = array<i32>} : memref<48x128xf32, #tpu.memory_space<vmem>>, vector<16x128xf32>,
    %c1_i32_46 = arith.constant 1 : i32
    %71 = tpu.dynamic_rotate %69 by %c1_i32_46 dim 1 : vector<16x128xf32>, i32 -> vector<16x128xf32>
    %72 = vector.broadcast %29 : vector<1x128xf32> to vector<16x128xf32>
    %73 = arith.mulf %71, %72 : vector<16x128xf32>
    %c127_i32_47 = arith.constant 127 : i32
    %74 = tpu.dynamic_rotate %69 by %c127_i32_47 dim 1 : vector<16x128xf32>, i32 -> vector<16x128xf32>
    %75 = vector.broadcast %33 : vector<1x128xf32> to vector<16x128xf32>
    %76 = arith.mulf %74, %75 : vector<16x128xf32>
    %c0_48 = arith.constant 0 : index
    %c0_49 = arith.constant 0 : index
    %77 = vector.load %arg9[%c0_48, %c0_49] : memref<48x128xf32, #tpu.memory_space<vmem>>, vector<16x128xf32>
    tpu.vector_store %arg9[%c0_48, %c0_49], %73 {strides = array<i32>} : memref<48x128xf32, #tpu.memory_space<vmem>>, vector<16x128xf32>,
    %c32_50 = arith.constant 32 : index
    %c0_51 = arith.constant 0 : index
    %78 = vector.load %arg9[%c32_50, %c0_51] : memref<48x128xf32, #tpu.memory_space<vmem>>, vector<16x128xf32>
    tpu.vector_store %arg9[%c32_50, %c0_51], %76 {strides = array<i32>} : memref<48x128xf32, #tpu.memory_space<vmem>>, vector<16x128xf32>,
    %c2 = arith.constant 2 : index
    %c0_52 = arith.constant 0 : index
    %c0_53 = arith.constant 0 : index
    %79 = vector.load %arg4[%c2, %c0_52, %c0_53] : memref<8x16x48xf32, #tpu.memory_space<vmem>>, vector<1x16x48xf32>
    %80 = vector.shape_cast %79 : vector<1x16x48xf32> to vector<16x48xf32>
    %c0_54 = arith.constant 0 : index
    %c0_55 = arith.constant 0 : index
    %81 = vector.load %arg9[%c0_54, %c0_55] : memref<48x128xf32, #tpu.memory_space<vmem>>, vector<48x128xf32>
    %cst_56 = arith.constant dense<0.000000e+00> : vector<16x128xf32>
    %82 = tpu.matmul %80, %81, %cst_56 {dimension_numbers = #tpu.dot_dimension_numbers<[1], [0], [0], [1], [0, 0, 1, 1], [], []>} : vector<16x48xf32>, vector<48x128xf32>, vector<16x128xf32> -> vector<16x128xf32>
    %c2_57 = arith.constant 2 : index
    %c0_58 = arith.constant 0 : index
    %c0_59 = arith.constant 0 : index
    %83 = vector.load %arg5[%c2_57, %c0_58, %c0_59] : memref<8x16x1xf32, #tpu.memory_space<vmem>>, vector<1x16x1xf32>
    %84 = vector.shape_cast %83 : vector<1x16x1xf32> to vector<16x1xf32>
    %85 = vector.broadcast %84 : vector<16x1xf32> to vector<16x128xf32>
    %86 = arith.addf %82, %85 : vector<16x128xf32>
    %cst_60 = arith.constant 0.000000e+00 : f32
    %87 = vector.broadcast %cst_60 : f32 to vector<16x128xf32>
    %88 = arith.maximumf %86, %87 : vector<16x128xf32>
    %c16_61 = arith.constant 16 : index
    %c0_62 = arith.constant 0 : index
    %89 = vector.load %arg9[%c16_61, %c0_62] : memref<48x128xf32, #tpu.memory_space<vmem>>, vector<16x128xf32>
    tpu.vector_store %arg9[%c16_61, %c0_62], %88 {strides = array<i32>} : memref<48x128xf32, #tpu.memory_space<vmem>>, vector<16x128xf32>,
    %c1_i32_63 = arith.constant 1 : i32
    %90 = tpu.dynamic_rotate %88 by %c1_i32_63 dim 1 : vector<16x128xf32>, i32 -> vector<16x128xf32>
    %91 = vector.broadcast %29 : vector<1x128xf32> to vector<16x128xf32>
    %92 = arith.mulf %90, %91 : vector<16x128xf32>
    %c127_i32_64 = arith.constant 127 : i32
    %93 = tpu.dynamic_rotate %88 by %c127_i32_64 dim 1 : vector<16x128xf32>, i32 -> vector<16x128xf32>
    %94 = vector.broadcast %33 : vector<1x128xf32> to vector<16x128xf32>
    %95 = arith.mulf %93, %94 : vector<16x128xf32>
    %c0_65 = arith.constant 0 : index
    %c0_66 = arith.constant 0 : index
    %96 = vector.load %arg9[%c0_65, %c0_66] : memref<48x128xf32, #tpu.memory_space<vmem>>, vector<16x128xf32>
    tpu.vector_store %arg9[%c0_65, %c0_66], %92 {strides = array<i32>} : memref<48x128xf32, #tpu.memory_space<vmem>>, vector<16x128xf32>,
    %c32_67 = arith.constant 32 : index
    %c0_68 = arith.constant 0 : index
    %97 = vector.load %arg9[%c32_67, %c0_68] : memref<48x128xf32, #tpu.memory_space<vmem>>, vector<16x128xf32>
    tpu.vector_store %arg9[%c32_67, %c0_68], %95 {strides = array<i32>} : memref<48x128xf32, #tpu.memory_space<vmem>>, vector<16x128xf32>,
    %c3 = arith.constant 3 : index
    %c0_69 = arith.constant 0 : index
    %c0_70 = arith.constant 0 : index
    %98 = vector.load %arg4[%c3, %c0_69, %c0_70] : memref<8x16x48xf32, #tpu.memory_space<vmem>>, vector<1x16x48xf32>
    %99 = vector.shape_cast %98 : vector<1x16x48xf32> to vector<16x48xf32>
    %c0_71 = arith.constant 0 : index
    %c0_72 = arith.constant 0 : index
    %100 = vector.load %arg9[%c0_71, %c0_72] : memref<48x128xf32, #tpu.memory_space<vmem>>, vector<48x128xf32>
    %cst_73 = arith.constant dense<0.000000e+00> : vector<16x128xf32>
    %101 = tpu.matmul %99, %100, %cst_73 {dimension_numbers = #tpu.dot_dimension_numbers<[1], [0], [0], [1], [0, 0, 1, 1], [], []>} : vector<16x48xf32>, vector<48x128xf32>, vector<16x128xf32> -> vector<16x128xf32>
    %c3_74 = arith.constant 3 : index
    %c0_75 = arith.constant 0 : index
    %c0_76 = arith.constant 0 : index
    %102 = vector.load %arg5[%c3_74, %c0_75, %c0_76] : memref<8x16x1xf32, #tpu.memory_space<vmem>>, vector<1x16x1xf32>
    %103 = vector.shape_cast %102 : vector<1x16x1xf32> to vector<16x1xf32>
    %104 = vector.broadcast %103 : vector<16x1xf32> to vector<16x128xf32>
    %105 = arith.addf %101, %104 : vector<16x128xf32>
    %106 = arith.addf %69, %105 : vector<16x128xf32>
    %cst_77 = arith.constant 0.000000e+00 : f32
    %107 = vector.broadcast %cst_77 : f32 to vector<16x128xf32>
    %108 = arith.maximumf %106, %107 : vector<16x128xf32>
    %c16_78 = arith.constant 16 : index
    %c0_79 = arith.constant 0 : index
    %109 = vector.load %arg9[%c16_78, %c0_79] : memref<48x128xf32, #tpu.memory_space<vmem>>, vector<16x128xf32>
    tpu.vector_store %arg9[%c16_78, %c0_79], %108 {strides = array<i32>} : memref<48x128xf32, #tpu.memory_space<vmem>>, vector<16x128xf32>,
    %c1_i32_80 = arith.constant 1 : i32
    %110 = tpu.dynamic_rotate %108 by %c1_i32_80 dim 1 : vector<16x128xf32>, i32 -> vector<16x128xf32>
    %111 = vector.broadcast %29 : vector<1x128xf32> to vector<16x128xf32>
    %112 = arith.mulf %110, %111 : vector<16x128xf32>
    %c127_i32_81 = arith.constant 127 : i32
    %113 = tpu.dynamic_rotate %108 by %c127_i32_81 dim 1 : vector<16x128xf32>, i32 -> vector<16x128xf32>
    %114 = vector.broadcast %33 : vector<1x128xf32> to vector<16x128xf32>
    %115 = arith.mulf %113, %114 : vector<16x128xf32>
    %c0_82 = arith.constant 0 : index
    %c0_83 = arith.constant 0 : index
    %116 = vector.load %arg9[%c0_82, %c0_83] : memref<48x128xf32, #tpu.memory_space<vmem>>, vector<16x128xf32>
    tpu.vector_store %arg9[%c0_82, %c0_83], %112 {strides = array<i32>} : memref<48x128xf32, #tpu.memory_space<vmem>>, vector<16x128xf32>,
    %c32_84 = arith.constant 32 : index
    %c0_85 = arith.constant 0 : index
    %117 = vector.load %arg9[%c32_84, %c0_85] : memref<48x128xf32, #tpu.memory_space<vmem>>, vector<16x128xf32>
    tpu.vector_store %arg9[%c32_84, %c0_85], %115 {strides = array<i32>} : memref<48x128xf32, #tpu.memory_space<vmem>>, vector<16x128xf32>,
    %c4 = arith.constant 4 : index
    %c0_86 = arith.constant 0 : index
    %c0_87 = arith.constant 0 : index
    %118 = vector.load %arg4[%c4, %c0_86, %c0_87] : memref<8x16x48xf32, #tpu.memory_space<vmem>>, vector<1x16x48xf32>
    %119 = vector.shape_cast %118 : vector<1x16x48xf32> to vector<16x48xf32>
    %c0_88 = arith.constant 0 : index
    %c0_89 = arith.constant 0 : index
    %120 = vector.load %arg9[%c0_88, %c0_89] : memref<48x128xf32, #tpu.memory_space<vmem>>, vector<48x128xf32>
    %cst_90 = arith.constant dense<0.000000e+00> : vector<16x128xf32>
    %121 = tpu.matmul %119, %120, %cst_90 {dimension_numbers = #tpu.dot_dimension_numbers<[1], [0], [0], [1], [0, 0, 1, 1], [], []>} : vector<16x48xf32>, vector<48x128xf32>, vector<16x128xf32> -> vector<16x128xf32>
    %c4_91 = arith.constant 4 : index
    %c0_92 = arith.constant 0 : index
    %c0_93 = arith.constant 0 : index
    %122 = vector.load %arg5[%c4_91, %c0_92, %c0_93] : memref<8x16x1xf32, #tpu.memory_space<vmem>>, vector<1x16x1xf32>
    %123 = vector.shape_cast %122 : vector<1x16x1xf32> to vector<16x1xf32>
    %124 = vector.broadcast %123 : vector<16x1xf32> to vector<16x128xf32>
    %125 = arith.addf %121, %124 : vector<16x128xf32>
    %cst_94 = arith.constant 0.000000e+00 : f32
    %126 = vector.broadcast %cst_94 : f32 to vector<16x128xf32>
    %127 = arith.maximumf %125, %126 : vector<16x128xf32>
    %c16_95 = arith.constant 16 : index
    %c0_96 = arith.constant 0 : index
    %128 = vector.load %arg9[%c16_95, %c0_96] : memref<48x128xf32, #tpu.memory_space<vmem>>, vector<16x128xf32>
    tpu.vector_store %arg9[%c16_95, %c0_96], %127 {strides = array<i32>} : memref<48x128xf32, #tpu.memory_space<vmem>>, vector<16x128xf32>,
    %c1_i32_97 = arith.constant 1 : i32
    %129 = tpu.dynamic_rotate %127 by %c1_i32_97 dim 1 : vector<16x128xf32>, i32 -> vector<16x128xf32>
    %130 = vector.broadcast %29 : vector<1x128xf32> to vector<16x128xf32>
    %131 = arith.mulf %129, %130 : vector<16x128xf32>
    %c127_i32_98 = arith.constant 127 : i32
    %132 = tpu.dynamic_rotate %127 by %c127_i32_98 dim 1 : vector<16x128xf32>, i32 -> vector<16x128xf32>
    %133 = vector.broadcast %33 : vector<1x128xf32> to vector<16x128xf32>
    %134 = arith.mulf %132, %133 : vector<16x128xf32>
    %c0_99 = arith.constant 0 : index
    %c0_100 = arith.constant 0 : index
    %135 = vector.load %arg9[%c0_99, %c0_100] : memref<48x128xf32, #tpu.memory_space<vmem>>, vector<16x128xf32>
    tpu.vector_store %arg9[%c0_99, %c0_100], %131 {strides = array<i32>} : memref<48x128xf32, #tpu.memory_space<vmem>>, vector<16x128xf32>,
    %c32_101 = arith.constant 32 : index
    %c0_102 = arith.constant 0 : index
    %136 = vector.load %arg9[%c32_101, %c0_102] : memref<48x128xf32, #tpu.memory_space<vmem>>, vector<16x128xf32>
    tpu.vector_store %arg9[%c32_101, %c0_102], %134 {strides = array<i32>} : memref<48x128xf32, #tpu.memory_space<vmem>>, vector<16x128xf32>,
    %c5 = arith.constant 5 : index
    %c0_103 = arith.constant 0 : index
    %c0_104 = arith.constant 0 : index
    %137 = vector.load %arg4[%c5, %c0_103, %c0_104] : memref<8x16x48xf32, #tpu.memory_space<vmem>>, vector<1x16x48xf32>
    %138 = vector.shape_cast %137 : vector<1x16x48xf32> to vector<16x48xf32>
    %c0_105 = arith.constant 0 : index
    %c0_106 = arith.constant 0 : index
    %139 = vector.load %arg9[%c0_105, %c0_106] : memref<48x128xf32, #tpu.memory_space<vmem>>, vector<48x128xf32>
    %cst_107 = arith.constant dense<0.000000e+00> : vector<16x128xf32>
    %140 = tpu.matmul %138, %139, %cst_107 {dimension_numbers = #tpu.dot_dimension_numbers<[1], [0], [0], [1], [0, 0, 1, 1], [], []>} : vector<16x48xf32>, vector<48x128xf32>, vector<16x128xf32> -> vector<16x128xf32>
    %c5_108 = arith.constant 5 : index
    %c0_109 = arith.constant 0 : index
    %c0_110 = arith.constant 0 : index
    %141 = vector.load %arg5[%c5_108, %c0_109, %c0_110] : memref<8x16x1xf32, #tpu.memory_space<vmem>>, vector<1x16x1xf32>
    %142 = vector.shape_cast %141 : vector<1x16x1xf32> to vector<16x1xf32>
    %143 = vector.broadcast %142 : vector<16x1xf32> to vector<16x128xf32>
    %144 = arith.addf %140, %143 : vector<16x128xf32>
    %145 = arith.addf %108, %144 : vector<16x128xf32>
    %c16_111 = arith.constant 16 : index
    %c0_112 = arith.constant 0 : index
    %146 = vector.load %arg9[%c16_111, %c0_112] : memref<48x128xf32, #tpu.memory_space<vmem>>, vector<16x128xf32>
    tpu.vector_store %arg9[%c16_111, %c0_112], %145 {strides = array<i32>} : memref<48x128xf32, #tpu.memory_space<vmem>>, vector<16x128xf32>,
    %c1_i32_113 = arith.constant 1 : i32
    %147 = tpu.dynamic_rotate %145 by %c1_i32_113 dim 1 : vector<16x128xf32>, i32 -> vector<16x128xf32>
    %148 = vector.broadcast %29 : vector<1x128xf32> to vector<16x128xf32>
    %149 = arith.mulf %147, %148 : vector<16x128xf32>
    %c127_i32_114 = arith.constant 127 : i32
    %150 = tpu.dynamic_rotate %145 by %c127_i32_114 dim 1 : vector<16x128xf32>, i32 -> vector<16x128xf32>
    %151 = vector.broadcast %33 : vector<1x128xf32> to vector<16x128xf32>
    %152 = arith.mulf %150, %151 : vector<16x128xf32>
    %c0_115 = arith.constant 0 : index
    %c0_116 = arith.constant 0 : index
    %153 = vector.load %arg9[%c0_115, %c0_116] : memref<48x128xf32, #tpu.memory_space<vmem>>, vector<16x128xf32>
    tpu.vector_store %arg9[%c0_115, %c0_116], %149 {strides = array<i32>} : memref<48x128xf32, #tpu.memory_space<vmem>>, vector<16x128xf32>,
    %c32_117 = arith.constant 32 : index
    %c0_118 = arith.constant 0 : index
    %154 = vector.load %arg9[%c32_117, %c0_118] : memref<48x128xf32, #tpu.memory_space<vmem>>, vector<16x128xf32>
    tpu.vector_store %arg9[%c32_117, %c0_118], %152 {strides = array<i32>} : memref<48x128xf32, #tpu.memory_space<vmem>>, vector<16x128xf32>,
    %c6 = arith.constant 6 : index
    %c0_119 = arith.constant 0 : index
    %c0_120 = arith.constant 0 : index
    %155 = vector.load %arg4[%c6, %c0_119, %c0_120] : memref<8x16x48xf32, #tpu.memory_space<vmem>>, vector<1x16x48xf32>
    %156 = vector.shape_cast %155 : vector<1x16x48xf32> to vector<16x48xf32>
    %c0_121 = arith.constant 0 : index
    %c0_122 = arith.constant 0 : index
    %157 = vector.load %arg9[%c0_121, %c0_122] : memref<48x128xf32, #tpu.memory_space<vmem>>, vector<48x128xf32>
    %cst_123 = arith.constant dense<0.000000e+00> : vector<16x128xf32>
    %158 = tpu.matmul %156, %157, %cst_123 {dimension_numbers = #tpu.dot_dimension_numbers<[1], [0], [0], [1], [0, 0, 1, 1], [], []>} : vector<16x48xf32>, vector<48x128xf32>, vector<16x128xf32> -> vector<16x128xf32>
    %c6_124 = arith.constant 6 : index
    %c0_125 = arith.constant 0 : index
    %c0_126 = arith.constant 0 : index
    %159 = vector.load %arg5[%c6_124, %c0_125, %c0_126] : memref<8x16x1xf32, #tpu.memory_space<vmem>>, vector<1x16x1xf32>
    %160 = vector.shape_cast %159 : vector<1x16x1xf32> to vector<16x1xf32>
    %161 = vector.broadcast %160 : vector<16x1xf32> to vector<16x128xf32>
    %162 = arith.addf %158, %161 : vector<16x128xf32>
    %cst_127 = arith.constant 0.000000e+00 : f32
    %163 = vector.broadcast %cst_127 : f32 to vector<16x128xf32>
    %164 = arith.maximumf %162, %163 : vector<16x128xf32>
    %c16_128 = arith.constant 16 : index
    %c0_129 = arith.constant 0 : index
    %165 = vector.load %arg9[%c16_128, %c0_129] : memref<48x128xf32, #tpu.memory_space<vmem>>, vector<16x128xf32>
    tpu.vector_store %arg9[%c16_128, %c0_129], %164 {strides = array<i32>} : memref<48x128xf32, #tpu.memory_space<vmem>>, vector<16x128xf32>,
    %c1_i32_130 = arith.constant 1 : i32
    %166 = tpu.dynamic_rotate %164 by %c1_i32_130 dim 1 : vector<16x128xf32>, i32 -> vector<16x128xf32>
    %167 = vector.broadcast %29 : vector<1x128xf32> to vector<16x128xf32>
    %168 = arith.mulf %166, %167 : vector<16x128xf32>
    %c127_i32_131 = arith.constant 127 : i32
    %169 = tpu.dynamic_rotate %164 by %c127_i32_131 dim 1 : vector<16x128xf32>, i32 -> vector<16x128xf32>
    %170 = vector.broadcast %33 : vector<1x128xf32> to vector<16x128xf32>
    %171 = arith.mulf %169, %170 : vector<16x128xf32>
    %c0_132 = arith.constant 0 : index
    %c0_133 = arith.constant 0 : index
    %172 = vector.load %arg9[%c0_132, %c0_133] : memref<48x128xf32, #tpu.memory_space<vmem>>, vector<16x128xf32>
    tpu.vector_store %arg9[%c0_132, %c0_133], %168 {strides = array<i32>} : memref<48x128xf32, #tpu.memory_space<vmem>>, vector<16x128xf32>,
    %c32_134 = arith.constant 32 : index
    %c0_135 = arith.constant 0 : index
    %173 = vector.load %arg9[%c32_134, %c0_135] : memref<48x128xf32, #tpu.memory_space<vmem>>, vector<16x128xf32>
    tpu.vector_store %arg9[%c32_134, %c0_135], %171 {strides = array<i32>} : memref<48x128xf32, #tpu.memory_space<vmem>>, vector<16x128xf32>,
    %c7 = arith.constant 7 : index
    %c0_136 = arith.constant 0 : index
    %c0_137 = arith.constant 0 : index
    %174 = vector.load %arg4[%c7, %c0_136, %c0_137] : memref<8x16x48xf32, #tpu.memory_space<vmem>>, vector<1x16x48xf32>
    %175 = vector.shape_cast %174 : vector<1x16x48xf32> to vector<16x48xf32>
    %c0_138 = arith.constant 0 : index
    %c0_139 = arith.constant 0 : index
    %176 = vector.load %arg9[%c0_138, %c0_139] : memref<48x128xf32, #tpu.memory_space<vmem>>, vector<48x128xf32>
    %cst_140 = arith.constant dense<0.000000e+00> : vector<16x128xf32>
    %177 = tpu.matmul %175, %176, %cst_140 {dimension_numbers = #tpu.dot_dimension_numbers<[1], [0], [0], [1], [0, 0, 1, 1], [], []>} : vector<16x48xf32>, vector<48x128xf32>, vector<16x128xf32> -> vector<16x128xf32>
    %c7_141 = arith.constant 7 : index
    %c0_142 = arith.constant 0 : index
    %c0_143 = arith.constant 0 : index
    %178 = vector.load %arg5[%c7_141, %c0_142, %c0_143] : memref<8x16x1xf32, #tpu.memory_space<vmem>>, vector<1x16x1xf32>
    %179 = vector.shape_cast %178 : vector<1x16x1xf32> to vector<16x1xf32>
    %180 = vector.broadcast %179 : vector<16x1xf32> to vector<16x128xf32>
    %181 = arith.addf %177, %180 : vector<16x128xf32>
    %182 = arith.addf %145, %181 : vector<16x128xf32>
    %c0_144 = arith.constant 0 : index
    %c0_145 = arith.constant 0 : index
    %183 = vector.load %arg6[%c0_144, %c0_145] : memref<1x128xf32, #tpu.memory_space<vmem>>, vector<1x128xf32>
    %184 = vector.shape_cast %183 : vector<1x128xf32> to vector<1x128xf32>
    %185 = vector.broadcast %184 : vector<1x128xf32> to vector<16x128xf32>
    %c0_146 = arith.constant 0 : index
    %c0_147 = arith.constant 0 : index
    %186 = vector.load %arg7[%c0_146, %c0_147] : memref<1x128xf32, #tpu.memory_space<vmem>>, vector<1x128xf32>
    %187 = vector.shape_cast %186 : vector<1x128xf32> to vector<1x128xf32>
    %188 = vector.broadcast %187 : vector<1x128xf32> to vector<16x128xf32>
    %cst_148 = arith.constant dense<0.000000e+00> : vector<16xf32>
    %189 = vector.multi_reduction <add>, %182, %cst_148 [1] : vector<16x128xf32> to vector<16xf32>
    %190 = vector.shape_cast %189 : vector<16xf32> to vector<16x1xf32>
    %cst_149 = arith.constant 1.280000e+02 : f32
    %191 = vector.broadcast %cst_149 : f32 to vector<16x1xf32>
    %192 = arith.divf %190, %191 : vector<16x1xf32>
    %193 = arith.mulf %182, %182 : vector<16x128xf32>
    %cst_150 = arith.constant dense<0.000000e+00> : vector<16xf32>
    %194 = vector.multi_reduction <add>, %193, %cst_150 [1] : vector<16x128xf32> to vector<16xf32>
    %195 = vector.shape_cast %194 : vector<16xf32> to vector<16x1xf32>
    %cst_151 = arith.constant 1.280000e+02 : f32
    %196 = vector.broadcast %cst_151 : f32 to vector<16x1xf32>
    %197 = arith.divf %195, %196 : vector<16x1xf32>
    %198 = arith.mulf %192, %192 : vector<16x1xf32>
    %199 = arith.subf %197, %198 : vector<16x1xf32>
    %200 = vector.broadcast %192 : vector<16x1xf32> to vector<16x128xf32>
    %201 = arith.subf %182, %200 : vector<16x128xf32>
    %cst_152 = arith.constant 9.99999974E-6 : f32
    %202 = vector.broadcast %cst_152 : f32 to vector<16x1xf32>
    %203 = arith.addf %199, %202 : vector<16x1xf32>
    %204 = math.rsqrt %203 : vector<16x1xf32>
    %205 = vector.broadcast %204 : vector<16x1xf32> to vector<16x128xf32>
    %206 = arith.mulf %201, %205 : vector<16x128xf32>
    %207 = arith.mulf %206, %185 : vector<16x128xf32>
    %208 = arith.addf %207, %188 : vector<16x128xf32>
    %c0_153 = arith.constant 0 : index
    %c0_154 = arith.constant 0 : index
    %c0_155 = arith.constant 0 : index
    %209 = vector.load %arg8[%c0_153, %c0_154, %c0_155] : memref<1x16x128xf32, #tpu.memory_space<vmem>>, vector<1x16x128xf32>
    %210 = vector.shape_cast %209 : vector<1x16x128xf32> to vector<16x128xf32>
    %211 = vector.shape_cast %208 : vector<16x128xf32> to vector<1x16x128xf32>
    tpu.vector_store %arg8[%c0_153, %c0_154, %c0_155], %211 {strides = array<i32>} : memref<1x16x128xf32, #tpu.memory_space<vmem>>, vector<1x16x128xf32>,
    return
  }
  func.func @transform_0(%arg0: i32) -> (i32, i32, i32) {
    %c0_i32 = arith.constant 0 : i32
    %c0_i32_0 = arith.constant 0 : i32
    %c0_i32_1 = arith.constant 0 : i32
    return %arg0, %c0_i32, %c0_i32_0 : i32, i32, i32
  }
  func.func @transform_1(%arg0: i32) -> (i32, i32) {
    %c0_i32 = arith.constant 0 : i32
    %c0_i32_0 = arith.constant 0 : i32
    %c0_i32_1 = arith.constant 0 : i32
    return %c0_i32, %c0_i32_0 : i32, i32
  }
  func.func @transform_2(%arg0: i32) -> (i32, i32) {
    %c0_i32 = arith.constant 0 : i32
    %c0_i32_0 = arith.constant 0 : i32
    %c0_i32_1 = arith.constant 0 : i32
    return %c0_i32, %c0_i32_0 : i32, i32
  }
  func.func @transform_3(%arg0: i32) -> (i32, i32, i32) {
    %c0_i32 = arith.constant 0 : i32
    %c0_i32_0 = arith.constant 0 : i32
    %c0_i32_1 = arith.constant 0 : i32
    %c0_i32_2 = arith.constant 0 : i32
    return %c0_i32, %c0_i32_0, %c0_i32_1 : i32, i32, i32
  }
  func.func @transform_4(%arg0: i32) -> (i32, i32, i32) {
    %c0_i32 = arith.constant 0 : i32
    %c0_i32_0 = arith.constant 0 : i32
    %c0_i32_1 = arith.constant 0 : i32
    %c0_i32_2 = arith.constant 0 : i32
    return %c0_i32, %c0_i32_0, %c0_i32_1 : i32, i32, i32
  }
  func.func @transform_5(%arg0: i32) -> (i32, i32) {
    %c0_i32 = arith.constant 0 : i32
    %c0_i32_0 = arith.constant 0 : i32
    %c0_i32_1 = arith.constant 0 : i32
    return %c0_i32, %c0_i32_0 : i32, i32
  }
  func.func @transform_6(%arg0: i32) -> (i32, i32) {
    %c0_i32 = arith.constant 0 : i32
    %c0_i32_0 = arith.constant 0 : i32
    %c0_i32_1 = arith.constant 0 : i32
    return %c0_i32, %c0_i32_0 : i32, i32
  }
  func.func @transform_7(%arg0: i32) -> (i32, i32, i32) {
    %c0_i32 = arith.constant 0 : i32
    %c0_i32_0 = arith.constant 0 : i32
    %c0_i32_1 = arith.constant 0 : i32
    return %arg0, %c0_i32, %c0_i32_0 : i32, i32, i32
  }
}

</mosaic_0001>

<bundles_post_ra>
// kernel: tpu_custom_call.1
= control target key start
LH: loop header
LB: loop body
LE: loop exit
PB: predicated region body
PF: predicated region fallthrough
CT: control target
= control target key end

     0   :  { %s1832_s0 = inlined_call_operand.hbm [shape: f32[2,16,64], index: 0, kind: input, shape index: {}]   ;;  %s1833_s1 = inlined_call_operand.hbm [shape: f32[64,128], index: 1, kind: input, shape index: {}]   ;;  %s1834_s2 = inlined_call_operand.vmem [shape: f32[1,128], index: 2, kind: input, shape index: {}]   ;;  %s1835_s3 = inlined_call_operand.vmem [shape: f32[8,16,48], index: 3, kind: input, shape index: {}]   ;;  %s1836_s4 = inlined_call_operand.vmem [shape: f32[8,16,1], index: 4, kind: input, shape index: {}]   ;;  %s1837_s5 = inlined_call_operand.vmem [shape: f32[1,128], index: 5, kind: input, shape index: {}]   ;;  %s1838_s6 = inlined_call_operand.vmem [shape: f32[1,128], index: 6, kind: input, shape index: {}]   ;;  %s1839_s7 = inlined_call_operand.hbm [shape: f32[2,16,128], index: 7, kind: output, shape index: {}]  }
   0x1   :  { %1842 = sst [smem:[#allocation12_spill]] %s1833_s1 }
   0x2   :  { %12 = vsyncpa [#allocation4], 0 }
   0x3   :  { %14 = vsyncpa [#allocation4 + $0x1], 0 }
   0x4   :  { %15 = vsyncpa [#allocation7], 0 }
   0x5   :  { %16 = vsyncpa [#allocation5], 0 }
   0x6   :  { %18 = vsyncpa [#allocation5 + $0x1], 0  ;;  %s1447_s24 = smov 0   ;;  %s1449_s25 = smov 0  }
   0x7   :  { %s1451_s26 = smov 0   ;;  %s1453_s27 = smov 0  }
   0x8 LB: > { %s1468_s28 = sadd.s32 4294967295, %s1395_s27   ;;  %s1115_s29 = sadd.s32 4294967294, %s1395_s27   ;;  %s1395_s27 = sphi %s1453_s27, %s1855_s27   ;;  %s1391_s26 = sphi %s1451_s26, %s1854_s26   ;;  %s1387_s25 = sphi %s1449_s25, %s1853_s25   ;;  %s1383_s24 = sphi %s1447_s24, %s1852_s24  }
   0x9   : > { %p44_p0 = scmp.ne.s32.totalorder %s1387_s25, %s1383_s24  ;;  %p45_p1 = scmp.eq.s32.totalorder %s1468_s28, 0 }
   0xa   : > { %p194_p2 = scmp.eq.s32.totalorder %s1468_s28, 1  ;;  %p200_p3 = scmp.eq.s32.totalorder %s1115_s29, 1 }
   0xb   : > { %p1477_p4 = por %p45_p1, %p44_p0  ;;  %p1116_p5 = scmp.ge.s32.totalorder %s1395_s27, 1 }
   0xc   : > { %p1482_p6 = por %p200_p3, %p44_p0  ;;  %p207_p7 = scmp.lt.s32.totalorder %s1395_s27, 3 }
   0xd   : > { %s1845_s1 = sld [smem:[#allocation12_spill]]  ;;  %s1397_s13 = smov [#allocation6]  }
   0xe   : > { %p1490_p8 = pnand %p1116_p5, %p207_p7  ;;  %s220_s14 = sshll.u32 %s1397_s13, 4  ;;  %s221_s14 = int_to_ptr.vmem [resolvable:$true] %s220_s14 }
   0xf   : > { %s1500_s15 = sadd.s32 1, %s1395_s27   ;;  %s1840_s16 = smov 128  }
  0x10   : > { %p1195_p9 = pneg %p1490_p8  ;;  %s1841_s17 = smov 8  }
  0x11   : > { %s28_s18 = ssub.s32 %s1395_s27, %s1500_s15  ;;  %s31_s19 = sadd.s32 1, %s1391_s26 }
  0x12   : > { %p1196_p10 = pnand %p1195_p9, %p45_p1  ;;  %p29_p12 = scmp.eq.s32.totalorder %s28_s18, 0 }
  0x13   : > { %s218_s11 = sshll.u32 %s1845_s1, 4  ;;  %p38_p13 = scmp.ne.s32.totalorder %s1391_s26, %s1387_s25  ;;  %s219_s11 = int_to_ptr.hbm [resolvable:$true] %s218_s11 }
  0x14   : > { %1198 = dma.hbm_to_vmem [thread:$0]  (!%p1196_p10), %s219_s11, 1024, %s221_s14, [#allocation7], %s1840_s16, %s1840_s16, %s1841_s17  }
  0x15   : > { %p39_p0 = scmp.eq.s32.totalorder %s1395_s27, 0  ;;  %p1516_p3 = por %p194_p2, %p38_p13 }
  0x16   : > { %s1512_s20 = scalar_select %p29_p12, %s1391_s26, %s31_s19  }
  0x17   : > { %p1208_p5 = scmp.lt.s32.totalorder %s1395_s27, 2  ;;  %s249_s22 = sand.u32 1, %s1391_s26  }
  0x18   : > { %s1179_s23 = sshll.u32 %s1395_s27, 4  ;;  %p40_p7 = por %p39_p0, %p38_p13 }
  0x19   : > { %s1119_s29 = sshll.u32 %s249_s22, 4  ;;  %s258_s11 = scalar_lea.hbm %s1832_s0, %s1179_s23 }
  0x1a   : > { %s259_s13 = sshll.u32 %s258_s11, 4  ;;  %s253_s14 = scalar_lea.vmem [#allocation3], %s1119_s29  ;;  %s260_s13 = int_to_ptr.hbm [resolvable:$true] %s259_s13 }
  0x1b   : > { %s261_s18 = sshll.u32 %s253_s14, 4  ;;  %p1526_p9 = pnand %p1208_p5, %p40_p7  ;;  %s262_s18 = int_to_ptr.vmem [resolvable:$true] %s261_s18 }
  0x1c   : > { %s250_s16 = scalar_lea.sflag [#allocation4], %s249_s22  ;;  %s1295_s17 = sshra.s32 %s260_s13, 4  ;;  %s1296_s17 = int_to_ptr.hbm [resolvable:$true] %s1295_s17 }
  0x1d   : > { %s1297_s1 = scalar_lea.hbm %s1296_s17, 16  ;;  %p1299_p10 = pneg %p1526_p9 }
  0x1e   : > { %p1298_p2 = scmp.ne.s32.totalorder %s1296_s17, %s1297_s1  ;;  %s1302_s29 = scalar_lea.hbm %s1832_s0, 32 }
  0x1f   : > { %p1303_p0 = scmp.lt.s32.totalorder %s1296_s17, %s1832_s0  ;;  %p1304_p5 = scmp.lt.s32.totalorder %s1302_s29, %s1297_s1 }
  0x20   : > { %p1300_p12 = pnand %p1299_p10, %p1298_p2 }
  0x21   : > { %p1305_p7 = por %p1304_p5, %p1303_p0 }
  0x22   : > { %p1301_p13 = pneg %p1300_p12 }
  0x24   : > { %p1306_p11 = pnand %p1305_p7, %p1301_p13 }
  0x26   : > { %1309 = shalt.err (!%p1306_p11)
}
  0x27   : > { %s1849_s22 = smov 8   ;;  %s1850_s14 = smov 128  }
  0x28   : > { %1202 = dma.hbm_to_vmem [thread:$0]  (!%p1526_p9), %s260_s13, 256, %s262_s18, %s250_s16, %s1850_s14, %s1850_s14, %s1849_s22  }
  0x29   : > { %273 = sbr.rel (%p1490_p8) target bundleno = 2519 (0x9d7), region = 48  ;;  %s1546_s23 = sand.u32 (!%p1490_p8), 1, %s1387_s25  }
  0x2a   : > { %s1123_s1 = sshll.u32 (!%p1490_p8), %s1546_s23, 4  ;;  %s276_s17 = scalar_lea.sflag (!%p1490_p8), [#allocation4], %s1546_s23 }
  0x2b   : > { %s279_s9 = scalar_lea.vmem (!%p1490_p8), [#allocation3], %s1123_s1 }
  0x2e   : > { %1370 = dma.done.wait (%p1477_p4), %s276_s17, 256  }
  0x2f   : > { %1372 = vsyncadd (%p1477_p4), %s276_s17, 4294967040 }
  0x30   : > { %1374 = dma.done.wait (%p45_p1), [#allocation7], 1024  }
  0x31   : > { %1376 = vsyncadd (%p45_p1), [#allocation7], 4294966272  ;;  %v325_v0 = vld [vmem:[#allocation6 + $0x38] sm:$0xff]  ;;  %v324_v1 = vld [vmem:[#allocation6 + $0x30] sm:$0xff]  ;;  %vm330_vm0 = vcmask 523264   ;;  %s1400_s16 = smov 1   ;;  %v364_v15 = vlaneseq }
  0x32   : > { %345 = vmatpush.msra.mxu0 %v325_v0  ;;  %v323_v2 = vld [vmem:[#allocation6 + $0x28] sm:$0xff]  ;;  %v322_v3 = vld [vmem:[#allocation6 + $0x20] sm:$0xff]  ;;  %v321_v4 = vld [vmem:[#allocation6 + $0x18] sm:$0xff]  ;;  %s1401_s13 = smov 127   ;;  %v1402_v18 = vmov 0   ;;  %v1403_v19 = vmov 0.0  }
  0x33   : > { %v320_v5 = vld [vmem:[#allocation6 + $0x10] sm:$0xff]  ;;  %v319_v6 = vld [vmem:[#allocation6 + $0x8] sm:$0xff]  ;;  %v318_v7 = vld [vmem:[#allocation6] sm:$0xff]  ;;  %v365_v16 = vand.u32 127, %v364_v15  ;;  %1253 = vset.pattern.permute.xlu2 %v1402_v18  ;;  %1254 = vset.pattern.permute.xlu1 %v1402_v18  ;;  %vm420_vm3 = vcmask 392192   ;;  %s1180_s18 = sshll.u32 %s1468_s28, 4 }
  0x34   : > { %346 = vmatpush.msra.mxu0 %v324_v1  ;;  %v316_v8 = vld [vmem:[%s279_s9] sm:$0xff]  ;;  %v317_v9 = vld [vmem:[%s279_s9 + $0x8] sm:$0xff]  ;;  %1255 = vset.pattern.permute.xlu0 %v1402_v18  ;;  %s1028_s10 = scalar_lea.hbm %s1839_s7, %s1180_s18  ;;  %s315_s11 = scalar_lea.vmem [#allocation8], %s1123_s1 }
  0x35   : > { %v1256_v11 = vld [vmem:[%s1834_s2] ss:$0 sm:$0xff]  ;;  %vm381_vm1 = vcmp.ne.s32.totalorder %v365_v16, 127  ;;  %v409_v17 = vld [vmem:[%s1836_s4 + $0x8] sm:$0xff]  ;;  %vm378_vm2 = vcmp.ne.s32.totalorder %v365_v16, 0  ;;  %v1134_v41 = vld [vmem:[%s1836_s4 + $0x10] sm:$0xff] }
  0x36   : > { %347 = vmatpush.msra.mxu0 %v323_v2  ;;  %v1578_v20 = vsel %vm381_vm1, 1.0, %v1403_v19  ;;  %417 = vperm.xlu2 %1253, %v409_v17   ;;  %v408_v23 = vld [vmem:[%s1836_s4] sm:$0xff]  ;;  %v1585_v27 = vsel %vm378_vm2, 1.0, %v1403_v19  ;;  %v401_v32 = vld [vmem:[%s1835_s3 + $0x8] sm:$0xff]  ;;  %v1135_v42 = vld [vmem:[%s1836_s4 + $0x18] sm:$0xff]  ;;  %s1031_s28 = sshll.u32 %s1028_s10, 4  ;;  %s1032_s28 = int_to_ptr.hbm [resolvable:$true] %s1031_s28 }
  0x37   : > { %v400_v31 = vld [vmem:[%s1835_s3] sm:$0xff]  ;;  %v1132_v51 = vld [vmem:[%s1835_s3 + $0x10] sm:$0xff]  ;;  %v1133_v52 = vld [vmem:[%s1835_s3 + $0x18] sm:$0xff]  ;;  %s1339_s22 = sshra.s32 %s1032_s28, 4  ;;  %s1345_s9 = scalar_lea.hbm %s1839_s7, 32  ;;  %s1340_s22 = int_to_ptr.hbm [resolvable:$true] %s1339_s22 }
  0x38   : > { %348 = vmatpush.msra.mxu0 %v322_v3  ;;  %v1141_v60 = vld [vmem:[%s1836_s4 + $0x28] sm:$0xff]  ;;  %v1140_v62 = vld [vmem:[%s1836_s4 + $0x20] sm:$0xff]  ;;  %v1147_v16 = vld [vmem:[%s1836_s4 + $0x38] sm:$0xff]  ;;  %s1341_s14 = scalar_lea.hbm %s1340_s22, 16  ;;  %p1346_p11 = scmp.lt.s32.totalorder %s1340_s22, %s1839_s7 }
  0x39   : > { %v1146_v18 = vld [vmem:[%s1836_s4 + $0x30] sm:$0xff]  ;;  %p1342_p1 = scmp.ne.s32.totalorder %s1340_s22, %s1341_s14  ;;  %p1347_p9 = scmp.lt.s32.totalorder %s1345_s9, %s1341_s14 }
  0x3a   : > { %349 = vmatpush.msra.mxu0 %v321_v4 }
  0x3b   : > { %p1343_p4 = pnand %p1342_p1, %p1516_p3  ;;  %p1348_p2 = por %p1347_p9, %p1346_p11 }
  0x3c   : > { %350 = vmatpush.msra.mxu0 %v320_v5 }
  0x3d   : > { %p1344_p8 = pneg %p1343_p4 }
  0x3e   : > { %351 = vmatpush.msra.mxu0 %v319_v6  ;;  %412 = vperm.xlu2 %1253, %v408_v23  }
  0x3f   : > { %p1349_p10 = pnand %p1348_p2, %p1344_p8 }
  0x40   : > { %352 = vmatpush.msra.mxu0 %v318_v7  ;;  %v1138_v7 = vld [vmem:[%s1835_s3 + $0x20] sm:$0xff] }
  0x41   : > { %1126 = vmatmul.msk.f32.vlgmr.msra.gmra.mxu0 %vm330_vm0, %v316_v8  ;;  %v1139_v8 = vld [vmem:[%s1835_s3 + $0x28] sm:$0xff] }
  0x49   : > { %1127 = vmatmul.msk.f32.gmra.mxu0 %vm330_vm0, %v317_v9 }
  0x90   : > { %v418_v33 = vpop.permute.xlu2 %417 }
  0x98   : > { %v413_v34 = vpop.permute.xlu2 %412 }
  0xbe   : > { %v354_v10 = vpop.f32.mrf.mxu0 }
  0xbf   : > { %v1569_v14 = vadd.f32 %v1256_v11, %v354_v10 }
  0xc6   : > { %v357_v12 = vpop.f32.mrf.mxu0 }
  0xc7   : > { %v1563_v13 = vadd.f32 %v1256_v11, %v357_v12 }
  0xc9   : > { %386 = vrot.lane.b32.xlu1 %v1563_v13, %s1400_s16  ;;  %392 = vrot.lane.b32.xlu0 %v1563_v13, %s1401_s13 }
  0xd1   : > { %384 = vrot.lane.b32.xlu1 %v1569_v14, %s1400_s16  ;;  %390 = vrot.lane.b32.xlu0 %v1569_v14, %s1401_s13 }
 0x13b   : > { %v393_v21 = vpop.permute.xlu0 %392  ;;  %v387_v24 = vpop.permute.xlu1 %386 }
 0x13c   : > { %v395_v22 = vmul.f32 %v1578_v20, %v393_v21  ;;  %v389_v29 = vmul.f32 %v1585_v27, %v387_v24 }
 0x13e   : > { %437 = vmatpush.msra.mxu1 %v395_v22 }
 0x143   : > { %v391_v25 = vpop.permute.xlu0 %390  ;;  %v385_v28 = vpop.permute.xlu1 %384 }
 0x144   : > { %v394_v26 = vmul.f32 %v1578_v20, %v391_v25  ;;  %v388_v30 = vmul.f32 %v1585_v27, %v385_v28 }
 0x146   : > { %438 = vmatpush.msra.mxu1 %v394_v26 }
 0x148   : > { %439 = vmatpush.msra.mxu1 %v1563_v13 }
 0x14a   : > { %440 = vmatpush.msra.mxu1 %v1569_v14 }
 0x14c   : > { %441 = vmatpush.msra.mxu1 %v389_v29  ;;  %v1144_v29 = vld [vmem:[%s1835_s3 + $0x30] sm:$0xff] }
 0x14e   : > { %442 = vmatpush.msra.mxu1 %v388_v30  ;;  %v1145_v30 = vld [vmem:[%s1835_s3 + $0x38] sm:$0xff] }
 0x14f   : > { %1130 = vmatmul.msk.f32.vlgmr.msra.gmra.mxu1 %vm420_vm3, %v400_v31 }
 0x157   : > { %1131 = vmatmul.msk.f32.gmra.mxu1 %vm420_vm3, %v401_v32 }
 0x1cc   : > { %v444_v35 = vpop.f32.mrf.mxu1 }
 0x1cd   : > { %v445_v36 = vadd.f32 %v444_v35, %v413_v34 }
 0x1cf   : > { %v450_v37 = vmax.f32 %v445_v36, 0.0 }
 0x1d1   : > { %460 = vrot.lane.b32.xlu1 %v450_v37, %s1401_s13 }
 0x1d4   : > { %v447_v38 = vpop.f32.mrf.mxu1 }
 0x1d5   : > { %v448_v39 = vadd.f32 %v447_v38, %v418_v33 }
 0x1d7   : > { %v451_v40 = vmax.f32 %v448_v39, 0.0 }
 0x1d9   : > { %456 = vrot.lane.b32.xlu2 %v451_v40, %s1400_s16  ;;  %462 = vrot.lane.b32.xlu0 %v451_v40, %s1401_s13 }
 0x1da   : > { %489 = vperm.xlu1 %1254, %v1135_v42   ;;  %v1152_v42 = vld [vmem:[%s1836_s4 + $0x40] sm:$0xff] }
 0x1e1   : > { %484 = vperm.xlu2 %1253, %v1134_v41   ;;  %454 = vrot.lane.b32.xlu0 %v450_v37, %s1400_s16 }
 0x233   : > { %v457_v47 = vpop.permute.xlu2 %456 }
 0x234   : > { %v459_v49 = vmul.f32 %v1585_v27, %v457_v47 }
 0x23b   : > { %v485_v53 = vpop.permute.xlu2 %484 }
 0x243   : > { %v461_v43 = vpop.permute.xlu1 %460 }
 0x244   : > { %v464_v46 = vmul.f32 %v1578_v20, %v461_v43 }
 0x24b   : > { %v463_v44 = vpop.permute.xlu0 %462 }
 0x24c   : > { %v465_v45 = vmul.f32 %v1578_v20, %v463_v44  ;;  %v490_v57 = vpop.permute.xlu1 %489 }
 0x24e   : > { %508 = vmatpush.msra.mxu2 %v465_v45 }
 0x250   : > { %509 = vmatpush.msra.mxu2 %v464_v46 }
 0x252   : > { %510 = vmatpush.msra.mxu2 %v451_v40  ;;  %v1153_v40 = vld [vmem:[%s1836_s4 + $0x48] sm:$0xff] }
 0x253   : > { %v455_v48 = vpop.permute.xlu0 %454 }
 0x254   : > { %511 = vmatpush.msra.mxu2 %v450_v37  ;;  %v458_v50 = vmul.f32 %v1585_v27, %v455_v48 }
 0x256   : > { %512 = vmatpush.msra.mxu2 %v459_v49 }
 0x258   : > { %513 = vmatpush.msra.mxu2 %v458_v50 }
 0x259   : > { %1136 = vmatmul.msk.f32.vlgmr.msra.gmra.mxu2 %vm420_vm3, %v1132_v51  ;;  %v1150_v51 = vld [vmem:[%s1835_s3 + $0x40] sm:$0xff] }
 0x261   : > { %1137 = vmatmul.msk.f32.gmra.mxu2 %vm420_vm3, %v1133_v52  ;;  %v1151_v52 = vld [vmem:[%s1835_s3 + $0x48] sm:$0xff] }
 0x2dc   : > { %v515_v54 = vpop.f32.mrf.mxu2 }
 0x2dd   : > { %v516_v55 = vadd.f32 %v515_v54, %v485_v53 }
 0x2df   : > { %v1622_v56 = vadd.f32 %v516_v55, %v1569_v14 }
 0x2e1   : > { %531 = vrot.lane.b32.xlu1 %v1622_v56, %s1401_s13 }
 0x2e4   : > { %v518_v58 = vpop.f32.mrf.mxu2 }
 0x2e5   : > { %v519_v59 = vadd.f32 %v518_v58, %v490_v57 }
 0x2e7   : > { %v1630_v61 = vadd.f32 %v519_v59, %v1563_v13 }
 0x2e9   : > { %560 = vperm.xlu1 %1254, %v1141_v60   ;;  %527 = vrot.lane.b32.xlu2 %v1630_v61, %s1400_s16  ;;  %v1159_v60 = vld [vmem:[%s1836_s4 + $0x58] sm:$0xff] }
 0x2ea   : > { %533 = vrot.lane.b32.xlu0 %v1630_v61, %s1401_s13 }
 0x2f1   : > { %555 = vperm.xlu2 %1253, %v1140_v62   ;;  %v1158_v62 = vld [vmem:[%s1836_s4 + $0x50] sm:$0xff] }
 0x2f2   : > { %525 = vrot.lane.b32.xlu0 %v1622_v56, %s1400_s16 }
 0x343   : > { %v528_v3 = vpop.permute.xlu2 %527 }
 0x344   : > { %v530_v5 = vmul.f32 %v1585_v27, %v528_v3 }
 0x34b   : > { %v556_v9 = vpop.permute.xlu2 %555 }
 0x353   : > { %v532_v63 = vpop.permute.xlu1 %531 }
 0x354   : > { %v535_v2 = vmul.f32 %v1578_v20, %v532_v63 }
 0x35b   : > { %v561_v13 = vpop.permute.xlu1 %560 }
 0x35c   : > { %v534_v0 = vpop.permute.xlu0 %533 }
 0x35d   : > { %v536_v1 = vmul.f32 %v1578_v20, %v534_v0 }
 0x35f   : > { %579 = vmatpush.msra.mxu3 %v536_v1 }
 0x361   : > { %580 = vmatpush.msra.mxu3 %v535_v2 }
 0x363   : > { %581 = vmatpush.msra.mxu3 %v1630_v61 }
 0x364   : > { %v526_v4 = vpop.permute.xlu0 %525 }
 0x365   : > { %582 = vmatpush.msra.mxu3 %v1622_v56  ;;  %v529_v6 = vmul.f32 %v1585_v27, %v526_v4 }
 0x367   : > { %583 = vmatpush.msra.mxu3 %v530_v5 }
 0x369   : > { %584 = vmatpush.msra.mxu3 %v529_v6 }
 0x36a   : > { %1142 = vmatmul.msk.f32.vlgmr.msra.gmra.mxu3 %vm420_vm3, %v1138_v7  ;;  %v1156_v7 = vld [vmem:[%s1835_s3 + $0x50] sm:$0xff] }
 0x372   : > { %1143 = vmatmul.msk.f32.gmra.mxu3 %vm420_vm3, %v1139_v8  ;;  %v1157_v8 = vld [vmem:[%s1835_s3 + $0x58] sm:$0xff] }
 0x3ed   : > { %v586_v10 = vpop.f32.mrf.mxu3 }
 0x3ee   : > { %v587_v11 = vadd.f32 %v586_v10, %v556_v9 }
 0x3f0   : > { %v592_v12 = vmax.f32 %v587_v11, 0.0 }
 0x3f2   : > { %602 = vrot.lane.b32.xlu1 %v592_v12, %s1401_s13 }
 0x3f5   : > { %v589_v14 = vpop.f32.mrf.mxu3 }
 0x3f6   : > { %v590_v15 = vadd.f32 %v589_v14, %v561_v13 }
 0x3f8   : > { %v593_v17 = vmax.f32 %v590_v15, 0.0 }
 0x3fa   : > { %631 = vperm.xlu1 %1254, %v1147_v16   ;;  %598 = vrot.lane.b32.xlu2 %v593_v17, %s1400_s16  ;;  %v1165_v16 = vld [vmem:[%s1836_s4 + $0x68] sm:$0xff] }
 0x3fb   : > { %604 = vrot.lane.b32.xlu0 %v593_v17, %s1401_s13 }
 0x402   : > { %626 = vperm.xlu2 %1253, %v1146_v18   ;;  %v1164_v18 = vld [vmem:[%s1836_s4 + $0x60] sm:$0xff] }
 0x403   : > { %596 = vrot.lane.b32.xlu0 %v592_v12, %s1400_s16 }
 0x454   : > { %v599_v24 = vpop.permute.xlu2 %598 }
 0x455   : > { %v601_v26 = vmul.f32 %v1585_v27, %v599_v24 }
 0x45c   : > { %v627_v31 = vpop.permute.xlu2 %626 }
 0x464   : > { %v603_v19 = vpop.permute.xlu1 %602 }
 0x465   : > { %v606_v23 = vmul.f32 %v1578_v20, %v603_v19 }
 0x46c   : > { %v632_v36 = vpop.permute.xlu1 %631 }
 0x46d   : > { %v605_v21 = vpop.permute.xlu0 %604 }
 0x46e   : > { %v607_v22 = vmul.f32 %v1578_v20, %v605_v21 }
 0x470   : > { %650 = vmatpush.msrb.mxu1 %v607_v22 }
 0x472   : > { %651 = vmatpush.msrb.mxu1 %v606_v23 }
 0x474   : > { %652 = vmatpush.msrb.mxu1 %v593_v17 }
 0x475   : > { %v597_v25 = vpop.permute.xlu0 %596 }
 0x476   : > { %653 = vmatpush.msrb.mxu1 %v592_v12  ;;  %v600_v28 = vmul.f32 %v1585_v27, %v597_v25 }
 0x478   : > { %654 = vmatpush.msrb.mxu1 %v601_v26 }
 0x47a   : > { %655 = vmatpush.msrb.mxu1 %v600_v28 }
 0x47b   : > { %1148 = vmatmul.msk.f32.vlgmr.msrb.gmra.mxu1 %vm420_vm3, %v1144_v29  ;;  %v1162_v29 = vld [vmem:[%s1835_s3 + $0x60] sm:$0xff] }
 0x483   : > { %1149 = vmatmul.msk.f32.gmra.mxu1 %vm420_vm3, %v1145_v30  ;;  %v1163_v30 = vld [vmem:[%s1835_s3 + $0x68] sm:$0xff] }
 0x4f8   : > { %v657_v32 = vpop.f32.mrf.mxu1 }
 0x4f9   : > { %v658_v33 = vadd.f32 %v657_v32, %v627_v31 }
 0x4fb   : > { %v663_v34 = vadd.f32 %v658_v33, %v1622_v56 }
 0x4fd   : > { %v1678_v35 = vmax.f32 %v663_v34, 0.0 }
 0x4ff   : > { %675 = vrot.lane.b32.xlu1 %v1678_v35, %s1401_s13 }
 0x500   : > { %v660_v37 = vpop.f32.mrf.mxu1 }
 0x501   : > { %v661_v38 = vadd.f32 %v660_v37, %v632_v36 }
 0x503   : > { %v664_v39 = vadd.f32 %v661_v38, %v1630_v61  ;;  %v1170_v38 = vld [vmem:[%s1836_s4 + $0x70] sm:$0xff] }
 0x505   : > { %v1686_v41 = vmax.f32 %v664_v39, 0.0 }
 0x507   : > { %704 = vperm.xlu1 %1254, %v1153_v40   ;;  %671 = vrot.lane.b32.xlu2 %v1686_v41, %s1400_s16  ;;  %v1171_v40 = vld [vmem:[%s1836_s4 + $0x78] sm:$0xff] }
 0x508   : > { %677 = vrot.lane.b32.xlu0 %v1686_v41, %s1401_s13 }
 0x50f   : > { %699 = vperm.xlu2 %1253, %v1152_v42  }
 0x510   : > { %669 = vrot.lane.b32.xlu0 %v1678_v35, %s1400_s16 }
 0x561   : > { %v672_v47 = vpop.permute.xlu2 %671 }
 0x562   : > { %v674_v49 = vmul.f32 %v1585_v27, %v672_v47 }
 0x569   : > { %v700_v53 = vpop.permute.xlu2 %699 }
 0x571   : > { %v676_v43 = vpop.permute.xlu1 %675 }
 0x572   : > { %v679_v46 = vmul.f32 %v1578_v20, %v676_v43 }
 0x579   : > { %v705_v57 = vpop.permute.xlu1 %704 }
 0x57a   : > { %v678_v44 = vpop.permute.xlu0 %677 }
 0x57b   : > { %v680_v45 = vmul.f32 %v1578_v20, %v678_v44 }
 0x57d   : > { %723 = vmatpush.msrb.mxu2 %v680_v45 }
 0x57f   : > { %724 = vmatpush.msrb.mxu2 %v679_v46 }
 0x581   : > { %725 = vmatpush.msrb.mxu2 %v1686_v41 }
 0x582   : > { %v670_v48 = vpop.permute.xlu0 %669 }
 0x583   : > { %726 = vmatpush.msrb.mxu2 %v1678_v35  ;;  %v673_v50 = vmul.f32 %v1585_v27, %v670_v48 }
 0x585   : > { %727 = vmatpush.msrb.mxu2 %v674_v49  ;;  %v1169_v49 = vld [vmem:[%s1835_s3 + $0x78] sm:$0xff] }
 0x587   : > { %728 = vmatpush.msrb.mxu2 %v673_v50 }
 0x588   : > { %1154 = vmatmul.msk.f32.vlgmr.msrb.gmra.mxu2 %vm420_vm3, %v1150_v51 }
 0x590   : > { %1155 = vmatmul.msk.f32.gmra.mxu2 %vm420_vm3, %v1151_v52 }
 0x60b   : > { %v730_v54 = vpop.f32.mrf.mxu2 }
 0x60c   : > { %v731_v55 = vadd.f32 %v730_v54, %v700_v53 }
 0x60e   : > { %v736_v56 = vmax.f32 %v731_v55, 0.0 }
 0x610   : > { %746 = vrot.lane.b32.xlu1 %v736_v56, %s1401_s13 }
 0x613   : > { %v733_v58 = vpop.f32.mrf.mxu2 }
 0x614   : > { %v734_v59 = vadd.f32 %v733_v58, %v705_v57 }
 0x616   : > { %v737_v61 = vmax.f32 %v734_v59, 0.0  ;;  %v1404_v59 = vmov 128.0  }
 0x617   : > { %1259 = vrcp.f32 %v1404_v59 }
 0x618   : > { %775 = vperm.xlu1 %1254, %v1159_v60   ;;  %742 = vrot.lane.b32.xlu2 %v737_v61, %s1400_s16 }
 0x619   : > { %748 = vrot.lane.b32.xlu0 %v737_v61, %s1401_s13 }
 0x61d   : > { %v1260_v60 = vpop.eup %1259 }
 0x61e   : > { %vm968_vm4 = vweird.f32 %v1260_v60 }
 0x620   : > { %770 = vperm.xlu2 %1253, %v1158_v62  }
 0x621   : > { %740 = vrot.lane.b32.xlu0 %v736_v56, %s1400_s16 }
 0x672   : > { %v743_v3 = vpop.permute.xlu2 %742 }
 0x673   : > { %v745_v5 = vmul.f32 %v1585_v27, %v743_v3 }
 0x67a   : > { %v771_v9 = vpop.permute.xlu2 %770 }
 0x682   : > { %v747_v63 = vpop.permute.xlu1 %746 }
 0x683   : > { %v750_v2 = vmul.f32 %v1578_v20, %v747_v63 }
 0x68a   : > { %v776_v13 = vpop.permute.xlu1 %775 }
 0x68b   : > { %v749_v0 = vpop.permute.xlu0 %748 }
 0x68c   : > { %v751_v1 = vmul.f32 %v1578_v20, %v749_v0 }
 0x68e   : > { %794 = vmatpush.msrb.mxu3 %v751_v1 }
 0x690   : > { %795 = vmatpush.msrb.mxu3 %v750_v2 }
 0x692   : > { %796 = vmatpush.msrb.mxu3 %v737_v61  ;;  %v964_v61 = vmul.f32 128.0, %v1260_v60 }
 0x693   : > { %v741_v4 = vpop.permute.xlu0 %740 }
 0x694   : > { %797 = vmatpush.msrb.mxu3 %v736_v56  ;;  %v744_v6 = vmul.f32 %v1585_v27, %v741_v4  ;;  %v965_v62 = vsub.f32 1.0, %v964_v61 }
 0x696   : > { %798 = vmatpush.msrb.mxu3 %v745_v5  ;;  %v966_v63 = vmul.f32 %v1260_v60, %v965_v62 }
 0x698   : > { %799 = vmatpush.msrb.mxu3 %v744_v6  ;;  %v967_v0 = vadd.f32 %v1260_v60, %v966_v63 }
 0x699   : > { %1160 = vmatmul.msk.f32.vlgmr.msrb.gmra.mxu3 %vm420_vm3, %v1156_v7 }
 0x69a   : > { %v969_v1 = vsel %vm968_vm4, %v1260_v60, %v967_v0 }
 0x6a1   : > { %1161 = vmatmul.msk.f32.gmra.mxu3 %vm420_vm3, %v1157_v8 }
 0x71c   : > { %v801_v10 = vpop.f32.mrf.mxu3 }
 0x71d   : > { %v802_v11 = vadd.f32 %v801_v10, %v771_v9 }
 0x71f   : > { %v1734_v12 = vadd.f32 %v802_v11, %v1678_v35 }
 0x721   : > { %817 = vrot.lane.b32.xlu1 %v1734_v12, %s1401_s13 }
 0x724   : > { %v804_v14 = vpop.f32.mrf.mxu3 }
 0x725   : > { %v805_v15 = vadd.f32 %v804_v14, %v776_v13 }
 0x727   : > { %v1742_v17 = vadd.f32 %v805_v15, %v1686_v41 }
 0x729   : > { %846 = vperm.xlu1 %1254, %v1165_v16   ;;  %813 = vrot.lane.b32.xlu2 %v1742_v17, %s1400_s16 }
 0x72a   : > { %819 = vrot.lane.b32.xlu0 %v1742_v17, %s1401_s13 }
 0x731   : > { %841 = vperm.xlu2 %1253, %v1164_v18  }
 0x732   : > { %811 = vrot.lane.b32.xlu0 %v1734_v12, %s1400_s16 }
 0x783   : > { %v814_v24 = vpop.permute.xlu2 %813 }
 0x784   : > { %v816_v26 = vmul.f32 %v1585_v27, %v814_v24 }
 0x78b   : > { %v842_v31 = vpop.permute.xlu2 %841 }
 0x793   : > { %v818_v19 = vpop.permute.xlu1 %817 }
 0x794   : > { %v821_v23 = vmul.f32 %v1578_v20, %v818_v19 }
 0x79b   : > { %v847_v35 = vpop.permute.xlu1 %846 }
 0x79c   : > { %v820_v21 = vpop.permute.xlu0 %819 }
 0x79d   : > { %v822_v22 = vmul.f32 %v1578_v20, %v820_v21 }
 0x79f   : > { %865 = vmatpush.msrb.mxu0 %v822_v22 }
 0x7a1   : > { %866 = vmatpush.msrb.mxu0 %v821_v23 }
 0x7a3   : > { %867 = vmatpush.msrb.mxu0 %v1742_v17 }
 0x7a4   : > { %v812_v25 = vpop.permute.xlu0 %811 }
 0x7a5   : > { %868 = vmatpush.msrb.mxu0 %v1734_v12  ;;  %v815_v28 = vmul.f32 %v1585_v27, %v812_v25 }
 0x7a7   : > { %869 = vmatpush.msrb.mxu0 %v816_v26  ;;  %v1257_v26 = vld [vmem:[%s1837_s5] ss:$0 sm:$0xff] }
 0x7a9   : > { %870 = vmatpush.msrb.mxu0 %v815_v28 }
 0x7aa   : > { %1166 = vmatmul.msk.f32.vlgmr.msrb.gmra.mxu0 %vm420_vm3, %v1162_v29 }
 0x7b2   : > { %1167 = vmatmul.msk.f32.gmra.mxu0 %vm420_vm3, %v1163_v30  ;;  %v1258_v30 = vld [vmem:[%s1838_s6] ss:$0 sm:$0xff] }
 0x827   : > { %v872_v32 = vpop.f32.mrf.mxu0 }
 0x828   : > { %v873_v33 = vadd.f32 %v872_v32, %v842_v31 }
 0x82a   : > { %v878_v34 = vmax.f32 %v873_v33, 0.0 }
 0x82c   : > { %888 = vrot.lane.b32.xlu1 %v878_v34, %s1401_s13 }
 0x82f   : > { %v875_v36 = vpop.f32.mrf.mxu0 }
 0x830   : > { %v876_v37 = vadd.f32 %v875_v36, %v847_v35 }
 0x832   : > { %v879_v39 = vmax.f32 %v876_v37, 0.0 }
 0x834   : > { %912 = vperm.xlu1 %1254, %v1170_v38   ;;  %884 = vrot.lane.b32.xlu2 %v879_v39, %s1400_s16 }
 0x835   : > { %890 = vrot.lane.b32.xlu0 %v879_v39, %s1401_s13  ;;  %s1017_s13 = scalar_lea.sflag [#allocation5], %s1546_s23 }
 0x83c   : > { %917 = vperm.xlu2 %1253, %v1171_v40  }
 0x83d   : > { %882 = vrot.lane.b32.xlu0 %v878_v34, %s1400_s16  ;;  %s1029_s16 = sshll.u32 %s315_s11, 4  ;;  %s1030_s16 = int_to_ptr.vmem [resolvable:$true] %s1029_s16 }
 0x88e   : > { %v885_v45 = vpop.permute.xlu2 %884 }
 0x88f   : > { %v887_v47 = vmul.f32 %v1585_v27, %v885_v45 }
 0x896   : > { %v918_v54 = vpop.permute.xlu2 %917 }
 0x89e   : > { %v889_v41 = vpop.permute.xlu1 %888 }
 0x89f   : > { %v892_v44 = vmul.f32 %v1578_v20, %v889_v41 }
 0x8a6   : > { %v913_v50 = vpop.permute.xlu1 %912 }
 0x8a7   : > { %v891_v42 = vpop.permute.xlu0 %890 }
 0x8a8   : > { %v893_v43 = vmul.f32 %v1578_v20, %v891_v42  ;;  %v1168_v20 = vld [vmem:[%s1835_s3 + $0x70] sm:$0xff] }
 0x8aa   : > { %936 = vmatpush.msra.mxu1 %v893_v43  ;;  %1181 = vmatpush.msra.mxu2 %v893_v43 }
 0x8ac   : > { %937 = vmatpush.msra.mxu1 %v892_v44  ;;  %1182 = vmatpush.msra.mxu2 %v892_v44 }
 0x8ae   : > { %938 = vmatpush.msra.mxu1 %v879_v39  ;;  %1183 = vmatpush.msra.mxu2 %v879_v39 }
 0x8af   : > { %v883_v46 = vpop.permute.xlu0 %882 }
 0x8b0   : > { %939 = vmatpush.msra.mxu1 %v878_v34  ;;  %1184 = vmatpush.msra.mxu2 %v878_v34  ;;  %v886_v48 = vmul.f32 %v1585_v27, %v883_v46 }
 0x8b2   : > { %940 = vmatpush.msra.mxu1 %v887_v47  ;;  %1185 = vmatpush.msra.mxu2 %v887_v47 }
 0x8b4   : > { %941 = vmatpush.msra.mxu1 %v886_v48  ;;  %1186 = vmatpush.msra.mxu2 %v886_v48 }
 0x8b5   : > { %1172 = vmatmul.msk.f32.vlgmr.msra.gmra.mxu1 %vm420_vm3, %v1168_v20  ;;  %1173 = vmatmul.msk.f32.vlgmr.msra.gmra.mxu2 %vm420_vm3, %v1169_v49 }
 0x932   : > { %v943_v51 = vpop.f32.mrf.mxu1 }
 0x933   : > { %v944_v52 = vadd.f32 %v943_v51, %v913_v50 }
 0x935   : > { %v949_v27 = vadd.f32 %v944_v52, %v1734_v12 }
 0x937   : > { %959 = vadd.xlane.f32.xlu0 %v949_v27  ;;  %v972_v53 = vmul.f32 %v949_v27, %v949_v27 }
 0x938   : > { %v946_v55 = vpop.f32.mrf.mxu2 }
 0x939   : > { %v947_v56 = vadd.f32 %v946_v55, %v918_v54  ;;  %974 = vadd.xlane.f32.xlu2 %v972_v53 }
 0x93b   : > { %v950_v57 = vadd.f32 %v947_v56, %v1742_v17 }
 0x93d   : > { %961 = vadd.xlane.f32.xlu1 %v950_v57  ;;  %v973_v58 = vmul.f32 %v950_v57, %v950_v57 }
 0x941   : > { %976 = vadd.xlane.f32.xlu2 %v973_v58 }
 0x9aa   : > { %v960_v2 = vpop.xlane.xlu0 %959 }
 0x9ab   : > { %v970_v3 = vmul.f32 %v969_v1, %v960_v2 }
 0x9ac   : > { %v975_v4 = vpop.xlane.xlu2 %974 }
 0x9ad   : > { %v980_v5 = vmul.f32 %v970_v3, %v970_v3  ;;  %v978_v6 = vmul.f32 %v975_v4, %v969_v1  ;;  %v984_v25 = vsub.f32 %v949_v27, %v970_v3 }
 0x9af   : > { %v982_v7 = vsub.f32 %v978_v6, %v980_v5 }
 0x9b0   : > { %v962_v8 = vpop.xlane.xlu1 %961 }
 0x9b1   : > { %v986_v9 = vadd.f32 1e-05, %v982_v7  ;;  %v971_v10 = vmul.f32 %v969_v1, %v962_v8 }
 0x9b3   : > { %1261 = vrsqrt.f32 %v986_v9  ;;  %v981_v12 = vmul.f32 %v971_v10, %v971_v10  ;;  %vm994_vm6 = vweird.f32 %v986_v9  ;;  %v985_v37 = vsub.f32 %v950_v57, %v971_v10 }
 0x9b4   : > { %v977_v11 = vpop.xlane.xlu2 %976 }
 0x9b5   : > { %v979_v13 = vmul.f32 %v977_v11, %v969_v1 }
 0x9b7   : > { %v983_v14 = vsub.f32 %v979_v13, %v981_v12 }
 0x9b9   : > { %v1262_v15 = vpop.eup %1261  ;;  %v987_v16 = vadd.f32 1e-05, %v983_v14 }
 0x9ba   : > { %v989_v17 = vmul.f32 %v1262_v15, %v986_v9  ;;  %vm995_vm5 = vweird.f32 %v1262_v15 }
 0x9bb   : > { %1263 = vrsqrt.f32 %v987_v16  ;;  %vm996_vm7 = vmor %vm994_vm6, %vm995_vm5  ;;  %vm1004_vm9 = vweird.f32 %v987_v16 }
 0x9bc   : > { %v990_v18 = vmul.f32 %v1262_v15, %v989_v17 }
 0x9be   : > { %v991_v19 = vmul.f32 0.5, %v990_v18 }
 0x9c0   : > { %v992_v21 = vsub.f32 1.5, %v991_v19 }
 0x9c1   : > { %v1264_v22 = vpop.eup %1263 }
 0x9c2   : > { %v993_v23 = vmul.f32 %v1262_v15, %v992_v21  ;;  %v999_v24 = vmul.f32 %v1264_v22, %v987_v16  ;;  %vm1005_vm8 = vweird.f32 %v1264_v22 }
 0x9c3   : > { %vm1006_vm10 = vmor %vm1004_vm9, %vm1005_vm8 }
 0x9c4   : > { %v997_v28 = vsel %vm996_vm7, %v1262_v15, %v993_v23  ;;  %v1000_v29 = vmul.f32 %v1264_v22, %v999_v24 }
 0x9c5   : > { %v1008_v31 = vmul.f32 %v997_v28, %v984_v25 }
 0x9c6   : > { %v1001_v32 = vmul.f32 0.5, %v1000_v29 }
 0x9c7   : > { %v1010_v33 = vmul.f32 %v1257_v26, %v1008_v31 }
 0x9c8   : > { %v1002_v34 = vsub.f32 1.5, %v1001_v32 }
 0x9c9   : > { %v1012_v35 = vadd.f32 %v1258_v30, %v1010_v33 }
 0x9ca   : > { %v1003_v36 = vmul.f32 %v1264_v22, %v1002_v34 }
 0x9cb   : > { %1014 = vst [vmem:[%s315_s11] sm:$0xff] %v1012_v35 }
 0x9cc   : > { %v1007_v38 = vsel %vm1006_vm10, %v1264_v22, %v1003_v36 }
 0x9cd   : > { %v1009_v39 = vmul.f32 %v1007_v38, %v985_v37 }
 0x9cf   : > { %v1011_v40 = vmul.f32 %v1257_v26, %v1009_v39 }
 0x9d1   : > { %v1013_v41 = vadd.f32 %v1258_v30, %v1011_v40 }
 0x9d3   : > { %1015 = vst [vmem:[%s315_s11 + $0x8] sm:$0xff] %v1013_v41 }
 0x9d4   : > { %1352 = shalt.err (!%p1349_p10)
}
 0x9d5   : > { %s1405_s23 = smov 128   ;;  %s1406_s18 = smov 8  }
 0x9d6   : > { %1193 = dma.vmem_to_hbm [thread:$0]  (%p1516_p3), %s1030_s16, 256, %s1032_s28, %s1017_s13, %s1405_s23, %s1405_s23, %s1406_s18  }
 0x9d7 PF: > { %s1046_s19 = sand.u32 1, %s1383_s24   ;;  %p1851_p12 = scmp.ge.s32.totalorder %s1395_s27, 2 }
 0x9d8   : > { %s1047_s29 = scalar_lea.sflag [#allocation5], %s1046_s19 }
 0x9d9   : > { %p1204_p13 = pnand %p1851_p12, %p1482_p6 }
 0x9db   : > { %p1205_p0 = pneg %p1204_p13 }
 0x9dd   : > { %1378 = dma.done.wait (%p1205_p0), %s1047_s29, 256  }
 0x9de   : > { %1380 = vsyncadd (%p1205_p0), %s1047_s29, 4294967040  ;;  %p21_p5 = scmp.ge.s32.totalorder %s1500_s15, 4   ;;  %s1852_s24 = smov %s1387_s25 }
 0x9df   : > { %s1853_s25 = smov %s1391_s26  ;;  %s1854_s26 = smov %s1512_s20 }
 0x9e0   : > { %s1855_s27 = smov %s1500_s15  ;;  %23 = sbr.rel (!%p21_p5) target bundleno = 8 (0x8), region = 111 }
 0x9e5   :  { %1053 = vsyncpa [#allocation4], 1 }
 0x9e6   :  { %1055 = vsyncpa [#allocation4 + $0x1], 1 }
 0x9e7   :  { %1056 = vsyncpa [#allocation7], 1 }
 0x9e8   :  { %1057 = vsyncpa [#allocation5], 1 }
 0x9e9   :  { %1059 = vsyncpa [#allocation5 + $0x1], 1 }

</bundles_post_ra>
